<compile_context>
chip_gen: v5e
topology: v5e:2x2
jax: 0.10.0
libtpu: 0.0.40
codegen_flags: <defaults>
</compile_context>

<pallas_src>
import functools

import jax
import jax.numpy as jnp
from jax.experimental import pallas as pl
from jax.experimental.pallas import tpu as pltpu

_LANES = 128
_NEG_BIG = -1.0e30  # masks padded action columns out of the log_softmax


def _round_up(x, m):
    return ((x + m - 1) // m) * m


def _choose_batch_tile(B):
    """Small B -> one tile (latency bound). Large B -> >=2 grid steps so both
    v7x TensorCores get work; tiles are multiples of 128 rows, capped at 512."""
    if B <= 256:
        return _round_up(max(B, 1), 8)
    half = _round_up(-(-B // 2), 128)
    return min(half, 512)


# ---------------- kernel ----------------

def fc_q_kernel(state_ref, w1_ref, b1_ref,
                q2w_ref, q2b_ref, i2w_ref, i2b_ref,
                q3w_ref, q3b_ref, i3w_ref, i3b_ref,
                out_ref, *, hidden, ap):
    x = state_ref[...].astype(jnp.bfloat16)  # (TB, S)

    # Layer 1 (fused q1|i1): bf16 matmul, f32 accumulate, f32 bias + relu.
    h = jnp.dot(x, w1_ref[...], preferred_element_type=jnp.float32) + b1_ref[...]
    h = jnp.maximum(h, 0.0)                  # (TB, 2H)

    # Split at the 128-aligned H boundary -> no relayout.
    hq = h[:, :hidden].astype(jnp.bfloat16)
    hi = h[:, hidden:].astype(jnp.bfloat16)

    # Layer 2 (separate q2 / i2 matmuls — half the MXU passes of block-diag).
    hq = jnp.maximum(
        jnp.dot(hq, q2w_ref[...], preferred_element_type=jnp.float32) + q2b_ref[...], 0.0)
    hi = jnp.maximum(
        jnp.dot(hi, i2w_ref[...], preferred_element_type=jnp.float32) + i2b_ref[...], 0.0)

    # Layer 3 (separate q3 / i3, lane-padded to ap=128 output columns).
    q_out = jnp.dot(hq.astype(jnp.bfloat16), q3w_ref[...],
                    preferred_element_type=jnp.float32) + q3b_ref[...]
    i_out = jnp.dot(hi.astype(jnp.bfloat16), i3w_ref[...],
                    preferred_element_type=jnp.float32) + i3b_ref[...]

    # Numerically stable log_softmax over the padded action lanes.  Padded
    # columns carry a -1e30 bias, so they neither win the max nor contribute
    # to the exp-sum (exp underflows to exactly 0).
    m = jnp.max(i_out, axis=1, keepdims=True)
    shifted = i_out - m
    lse = jnp.log(jnp.sum(jnp.exp(shifted), axis=1, keepdims=True))
    logp = shifted - lse

    # Three 128-aligned slab writes into one lane-dense (TB, 3*ap) block.
    out_ref[:, 0:ap] = q_out.astype(out_ref.dtype)
    out_ref[:, ap:2 * ap] = logp.astype(out_ref.dtype)
    out_ref[:, 2 * ap:3 * ap] = i_out.astype(out_ref.dtype)


# ---------------- wrapper ----------------

def fc_q_forward(state, packed):
    """state: (B, state_dim) f32.  packed: output of pack_params()."""
    B, S = state.shape
    A = packed["num_actions"]
    Ap = packed["Ap"]
    H = packed["hidden"]

    TB = _choose_batch_tile(B)
    B_pad = _round_up(B, TB)
    if B_pad != B:
        state = jnp.pad(state, ((0, B_pad - B), (0, 0)))
    grid = (B_pad // TB,)

    kernel = functools.partial(fc_q_kernel, hidden=H, ap=Ap)

    # Advisory cost estimate so XLA can schedule around this small call.
    flops = 2 * B_pad * (S * 2 * H + 2 * H * H + 2 * H * Ap)
    bytes_accessed = (
        state.size * 4
        + (packed["w1"].size + packed["q2_w"].size + packed["i2_w"].size
           + packed["q3_w"].size + packed["i3_w"].size) * 2
        + (packed["b1"].size + packed["q2_b"].size + packed["i2_b"].size
           + packed["q3_b"].size + packed["i3_b"].size) * 4
        + B_pad * 3 * Ap * 4
    )
    cost = pl.CostEstimate(flops=flops, transcendentals=B_pad * (Ap + 1),
                           bytes_accessed=bytes_accessed)

    def _resident(arr):  # constant-index spec -> weight stays VMEM-resident
        return pl.BlockSpec(arr.shape, lambda i: (0, 0))

    out = pl.pallas_call(
        kernel,
        out_shape=jax.ShapeDtypeStruct((B_pad, 3 * Ap), jnp.float32),
        grid=grid,
        in_specs=[
            pl.BlockSpec((TB, S), lambda i: (i, 0)),   # state tile
            _resident(packed["w1"]), _resident(packed["b1"]),
            _resident(packed["q2_w"]), _resident(packed["q2_b"]),
            _resident(packed["i2_w"]), _resident(packed["i2_b"]),
            _resident(packed["q3_w"]), _resident(packed["q3_b"]),
            _resident(packed["i3_w"]), _resident(packed["i3_b"]),
        ],
        out_specs=pl.BlockSpec((TB, 3 * Ap), lambda i: (i, 0)),
        compiler_params=pltpu.CompilerParams(dimension_semantics=("parallel",)),
        cost_estimate=cost,
    )(state, packed["w1"], packed["b1"],
      packed["q2_w"], packed["q2_b"], packed["i2_w"], packed["i2_b"],
      packed["q3_w"], packed["q3_b"], packed["i3_w"], packed["i3_b"])

    q_out = out[:B, 0:A]
    logp = out[:B, Ap:Ap + A]
    i_out = out[:B, 2 * Ap:2 * Ap + A]
    return q_out, logp, i_out


# ---------------- parameter construction / packing ----------------

def init_linear(key, fan_in, fan_out):
    """PyTorch nn.Linear default init: U(-1/sqrt(fan_in), 1/sqrt(fan_in)).
    Weight returned pre-transposed to (fan_in, fan_out)."""
    kw, kb = jax.random.split(key)
    bound = 1.0 / jnp.sqrt(jnp.float32(fan_in))
    w = jax.random.uniform(kw, (fan_in, fan_out), jnp.float32, -bound, bound)
    b = jax.random.uniform(kb, (1, fan_out), jnp.float32, -bound, bound)
    return w, b


def make_params(key, state_dim, num_actions, hidden=256):
    keys = jax.random.split(key, 6)
    p = {}
    p["q1_w"], p["q1_b"] = init_linear(keys[0], state_dim, hidden)
    p["q2_w"], p["q2_b"] = init_linear(keys[1], hidden, hidden)
    p["q3_w"], p["q3_b"] = init_linear(keys[2], hidden, num_actions)
    p["i1_w"], p["i1_b"] = init_linear(keys[3], state_dim, hidden)
    p["i2_w"], p["i2_b"] = init_linear(keys[4], hidden, hidden)
    p["i3_w"], p["i3_b"] = init_linear(keys[5], hidden, num_actions)
    return p


def pack_params(params):
    """Fuse layer 1, keep layers 2/3 per-branch, lane-pad the action dim to 128.
    Weights in bf16 (MXU-native), biases f32.  Padded i3 bias columns get -1e30
    so they vanish from the in-kernel log_softmax."""
    H = params["q1_w"].shape[1]
    A = params["q3_w"].shape[1]
    Ap = _round_up(A, _LANES)
    pad_a = Ap - A

    w1 = jnp.concatenate([params["q1_w"], params["i1_w"]], axis=1).astype(jnp.bfloat16)
    b1 = jnp.concatenate([params["q1_b"], params["i1_b"]], axis=1)

    q2_w = params["q2_w"].astype(jnp.bfloat16)
    i2_w = params["i2_w"].astype(jnp.bfloat16)
    q2_b = params["q2_b"]
    i2_b = params["i2_b"]

    q3_w = jnp.pad(params["q3_w"], ((0, 0), (0, pad_a))).astype(jnp.bfloat16)
    i3_w = jnp.pad(params["i3_w"], ((0, 0), (0, pad_a))).astype(jnp.bfloat16)
    q3_b = jnp.pad(params["q3_b"], ((0, 0), (0, pad_a)))
    i3_b = jnp.pad(params["i3_b"], ((0, 0), (0, pad_a)),
                   constant_values=_NEG_BIG)

    return dict(w1=w1, b1=b1,
                q2_w=q2_w, q2_b=q2_b, i2_w=i2_w, i2_b=i2_b,
                q3_w=q3_w, q3_b=q3_b, i3_w=i3_w, i3_b=i3_b,
                num_actions=A, Ap=Ap, hidden=H)


# ---------------- references ----------------

def reference_forward_packed(state, packed):
    """Same numerics as the kernel (bf16 weights/activations, f32 accumulate)."""
    A = packed["num_actions"]
    H = packed["hidden"]
    h = jnp.dot(state.astype(jnp.bfloat16), packed["w1"],
                preferred_element_type=jnp.float32) + packed["b1"]
    h = jnp.maximum(h, 0.0)
    hq, hi = h[:, :H], h[:, H:]
    hq = jnp.maximum(jnp.dot(hq.astype(jnp.bfloat16), packed["q2_w"],
                             preferred_element_type=jnp.float32) + packed["q2_b"], 0.0)
    hi = jnp.maximum(jnp.dot(hi.astype(jnp.bfloat16), packed["i2_w"],
                             preferred_element_type=jnp.float32) + packed["i2_b"], 0.0)
    q_out = (jnp.dot(hq.astype(jnp.bfloat16), packed["q3_w"],
                     preferred_element_type=jnp.float32) + packed["q3_b"])[:, :A]
    i_out = (jnp.dot(hi.astype(jnp.bfloat16), packed["i3_w"],
                     preferred_element_type=jnp.float32) + packed["i3_b"])[:, :A]
    return q_out, jax.nn.log_softmax(i_out, axis=1), i_out


def reference_forward_f32(state, p):
    """Plain f32 JAX reference mirroring the PyTorch forward."""
    q = jax.nn.relu(state @ p["q1_w"] + p["q1_b"])
    q = jax.nn.relu(q @ p["q2_w"] + p["q2_b"])
    q_out = q @ p["q3_w"] + p["q3_b"]
    i = jax.nn.relu(state @ p["i1_w"] + p["i1_b"])
    i = jax.nn.relu(i @ p["i2_w"] + p["i2_b"])
    i_out = i @ p["i3_w"] + p["i3_b"]
    return q_out, jax.nn.log_softmax(i_out, axis=1), i_out


if __name__ == "__main__":
    key = jax.random.PRNGKey(0)
    k_params, k_state, k_state2 = jax.random.split(key, 3)

    state_dim = 8
    num_actions = 4

    params = make_params(k_params, state_dim, num_actions)
    packed = pack_params(params)

    # --- small (shipped) size: B=8 ---
    state = jax.random.normal(k_state, (8, state_dim), jnp.float32)
    q_out, logp_out, i_out = fc_q_forward(state, packed)
    jax.block_until_ready((q_out, logp_out, i_out))

    q_ref, logp_ref, i_ref = reference_forward_packed(state, packed)
    assert jnp.allclose(q_out, q_ref, atol=2e-3, rtol=2e-3), "q mismatch (packed ref)"
    assert jnp.allclose(logp_out, logp_ref, atol=2e-3, rtol=2e-3), "log_softmax mismatch (packed ref)"
    assert jnp.allclose(i_out, i_ref, atol=2e-3, rtol=2e-3), "i mismatch (packed ref)"

    q32, logp32, i32 = reference_forward_f32(state, params)
    assert jnp.allclose(q_out, q32, atol=5e-2), "q mismatch (f32 ref)"
    assert jnp.allclose(logp_out, logp32, atol=5e-2), "log_softmax mismatch (f32 ref)"
    assert jnp.allclose(i_out, i32, atol=5e-2), "i mismatch (f32 ref)"

    # --- ragged multi-tile path: B=300 (pads to 512, grid=(2,)) ---
    state2 = jax.random.normal(k_state2, (300, state_dim), jnp.float32)
    q2, lp2, i2 = fc_q_forward(state2, packed)
    jax.block_until_ready((q2, lp2, i2))
    q2r, lp2r, i2r = reference_forward_packed(state2, packed)
    assert jnp.allclose(q2, q2r, atol=2e-3, rtol=2e-3), "q mismatch (multi-tile)"
    assert jnp.allclose(lp2, lp2r, atol=2e-3, rtol=2e-3), "log_softmax mismatch (multi-tile)"
    assert jnp.allclose(i2, i2r, atol=2e-3, rtol=2e-3), "i mismatch (multi-tile)"

    print("KERNEL_OK")
</pallas_src>

<mosaic_0001>
module attributes {stable_mosaic.version = 11 : i64} {
  func.func @fc_q_kernel(%arg0: i32, %arg1: memref<8x8xf32, #tpu.memory_space<vmem>>, %arg2: memref<8x512xbf16, #tpu.memory_space<vmem>>, %arg3: memref<1x512xf32, #tpu.memory_space<vmem>>, %arg4: memref<256x256xbf16, #tpu.memory_space<vmem>>, %arg5: memref<1x256xf32, #tpu.memory_space<vmem>>, %arg6: memref<256x256xbf16, #tpu.memory_space<vmem>>, %arg7: memref<1x256xf32, #tpu.memory_space<vmem>>, %arg8: memref<256x128xbf16, #tpu.memory_space<vmem>>, %arg9: memref<1x128xf32, #tpu.memory_space<vmem>>, %arg10: memref<256x128xbf16, #tpu.memory_space<vmem>>, %arg11: memref<1x128xf32, #tpu.memory_space<vmem>>, %arg12: memref<8x384xf32, #tpu.memory_space<vmem>>) attributes {dimension_semantics = [#tpu.dimension_semantics<parallel>], iteration_bounds = array<i64: 1>, scalar_prefetch = 0 : i64, scratch_operands = 0 : i64, tpu.core_type = #tpu.core_type<tc>, window_params = [{transform_indices = @transform_0, window_bounds = array<i64: 8, 8>}, {pipeline_mode = #tpu.pipeline_mode<synchronous>, transform_indices = @transform_1, window_bounds = array<i64: 8, 512>}, {pipeline_mode = #tpu.pipeline_mode<synchronous>, transform_indices = @transform_2, window_bounds = array<i64: 1, 512>}, {pipeline_mode = #tpu.pipeline_mode<synchronous>, transform_indices = @transform_3, window_bounds = array<i64: 256, 256>}, {pipeline_mode = #tpu.pipeline_mode<synchronous>, transform_indices = @transform_4, window_bounds = array<i64: 1, 256>}, {pipeline_mode = #tpu.pipeline_mode<synchronous>, transform_indices = @transform_5, window_bounds = array<i64: 256, 256>}, {pipeline_mode = #tpu.pipeline_mode<synchronous>, transform_indices = @transform_6, window_bounds = array<i64: 1, 256>}, {pipeline_mode = #tpu.pipeline_mode<synchronous>, transform_indices = @transform_7, window_bounds = array<i64: 256, 128>}, {pipeline_mode = #tpu.pipeline_mode<synchronous>, transform_indices = @transform_8, window_bounds = array<i64: 1, 128>}, {pipeline_mode = #tpu.pipeline_mode<synchronous>, transform_indices = @transform_9, window_bounds = array<i64: 256, 128>}, {pipeline_mode = #tpu.pipeline_mode<synchronous>, transform_indices = @transform_10, window_bounds = array<i64: 1, 128>}, {transform_indices = @transform_11, window_bounds = array<i64: 8, 384>}]} {
    %c0 = arith.constant 0 : index
    %c0_0 = arith.constant 0 : index
    %0 = vector.load %arg1[%c0, %c0_0] : memref<8x8xf32, #tpu.memory_space<vmem>>, vector<8x8xf32>
    %1 = arith.truncf %0 : vector<8x8xf32> to vector<8x8xbf16>
    %c0_1 = arith.constant 0 : index
    %c0_2 = arith.constant 0 : index
    %2 = vector.load %arg2[%c0_1, %c0_2] : memref<8x512xbf16, #tpu.memory_space<vmem>>, vector<8x512xbf16>
    %cst = arith.constant dense<0.000000e+00> : vector<8x512xf32>
    %3 = tpu.matmul %1, %2, %cst {dimension_numbers = #tpu.dot_dimension_numbers<[1], [0], [0], [1], [0, 0, 1, 1], [], []>} : vector<8x8xbf16>, vector<8x512xbf16>, vector<8x512xf32> -> vector<8x512xf32>
    %c0_3 = arith.constant 0 : index
    %c0_4 = arith.constant 0 : index
    %4 = vector.load %arg3[%c0_3, %c0_4] : memref<1x512xf32, #tpu.memory_space<vmem>>, vector<1x512xf32>
    %5 = vector.broadcast %4 : vector<1x512xf32> to vector<8x512xf32>
    %6 = arith.addf %3, %5 : vector<8x512xf32>
    %cst_5 = arith.constant 0.000000e+00 : f32
    %7 = vector.broadcast %cst_5 : f32 to vector<8x512xf32>
    %8 = arith.maximumf %6, %7 : vector<8x512xf32>
    %9 = vector.extract_strided_slice %8 {offsets = [0, 0], sizes = [8, 256], strides = [1, 1]} : vector<8x512xf32> to vector<8x256xf32>
    %10 = arith.truncf %9 : vector<8x256xf32> to vector<8x256xbf16>
    %11 = vector.extract_strided_slice %8 {offsets = [0, 256], sizes = [8, 256], strides = [1, 1]} : vector<8x512xf32> to vector<8x256xf32>
    %12 = arith.truncf %11 : vector<8x256xf32> to vector<8x256xbf16>
    %c0_6 = arith.constant 0 : index
    %c0_7 = arith.constant 0 : index
    %13 = vector.load %arg4[%c0_6, %c0_7] : memref<256x256xbf16, #tpu.memory_space<vmem>>, vector<256x256xbf16>
    %cst_8 = arith.constant dense<0.000000e+00> : vector<8x256xf32>
    %14 = tpu.matmul %10, %13, %cst_8 {dimension_numbers = #tpu.dot_dimension_numbers<[1], [0], [0], [1], [0, 0, 1, 1], [], []>} : vector<8x256xbf16>, vector<256x256xbf16>, vector<8x256xf32> -> vector<8x256xf32>
    %c0_9 = arith.constant 0 : index
    %c0_10 = arith.constant 0 : index
    %15 = vector.load %arg5[%c0_9, %c0_10] : memref<1x256xf32, #tpu.memory_space<vmem>>, vector<1x256xf32>
    %16 = vector.broadcast %15 : vector<1x256xf32> to vector<8x256xf32>
    %17 = arith.addf %14, %16 : vector<8x256xf32>
    %cst_11 = arith.constant 0.000000e+00 : f32
    %18 = vector.broadcast %cst_11 : f32 to vector<8x256xf32>
    %19 = arith.maximumf %17, %18 : vector<8x256xf32>
    %c0_12 = arith.constant 0 : index
    %c0_13 = arith.constant 0 : index
    %20 = vector.load %arg6[%c0_12, %c0_13] : memref<256x256xbf16, #tpu.memory_space<vmem>>, vector<256x256xbf16>
    %cst_14 = arith.constant dense<0.000000e+00> : vector<8x256xf32>
    %21 = tpu.matmul %12, %20, %cst_14 {dimension_numbers = #tpu.dot_dimension_numbers<[1], [0], [0], [1], [0, 0, 1, 1], [], []>} : vector<8x256xbf16>, vector<256x256xbf16>, vector<8x256xf32> -> vector<8x256xf32>
    %c0_15 = arith.constant 0 : index
    %c0_16 = arith.constant 0 : index
    %22 = vector.load %arg7[%c0_15, %c0_16] : memref<1x256xf32, #tpu.memory_space<vmem>>, vector<1x256xf32>
    %23 = vector.broadcast %22 : vector<1x256xf32> to vector<8x256xf32>
    %24 = arith.addf %21, %23 : vector<8x256xf32>
    %cst_17 = arith.constant 0.000000e+00 : f32
    %25 = vector.broadcast %cst_17 : f32 to vector<8x256xf32>
    %26 = arith.maximumf %24, %25 : vector<8x256xf32>
    %27 = arith.truncf %19 : vector<8x256xf32> to vector<8x256xbf16>
    %c0_18 = arith.constant 0 : index
    %c0_19 = arith.constant 0 : index
    %28 = vector.load %arg8[%c0_18, %c0_19] : memref<256x128xbf16, #tpu.memory_space<vmem>>, vector<256x128xbf16>
    %cst_20 = arith.constant dense<0.000000e+00> : vector<8x128xf32>
    %29 = tpu.matmul %27, %28, %cst_20 {dimension_numbers = #tpu.dot_dimension_numbers<[1], [0], [0], [1], [0, 0, 1, 1], [], []>} : vector<8x256xbf16>, vector<256x128xbf16>, vector<8x128xf32> -> vector<8x128xf32>
    %c0_21 = arith.constant 0 : index
    %c0_22 = arith.constant 0 : index
    %30 = vector.load %arg9[%c0_21, %c0_22] : memref<1x128xf32, #tpu.memory_space<vmem>>, vector<1x128xf32>
    %31 = vector.broadcast %30 : vector<1x128xf32> to vector<8x128xf32>
    %32 = arith.addf %29, %31 : vector<8x128xf32>
    %33 = arith.truncf %26 : vector<8x256xf32> to vector<8x256xbf16>
    %c0_23 = arith.constant 0 : index
    %c0_24 = arith.constant 0 : index
    %34 = vector.load %arg10[%c0_23, %c0_24] : memref<256x128xbf16, #tpu.memory_space<vmem>>, vector<256x128xbf16>
    %cst_25 = arith.constant dense<0.000000e+00> : vector<8x128xf32>
    %35 = tpu.matmul %33, %34, %cst_25 {dimension_numbers = #tpu.dot_dimension_numbers<[1], [0], [0], [1], [0, 0, 1, 1], [], []>} : vector<8x256xbf16>, vector<256x128xbf16>, vector<8x128xf32> -> vector<8x128xf32>
    %c0_26 = arith.constant 0 : index
    %c0_27 = arith.constant 0 : index
    %36 = vector.load %arg11[%c0_26, %c0_27] : memref<1x128xf32, #tpu.memory_space<vmem>>, vector<1x128xf32>
    %37 = vector.broadcast %36 : vector<1x128xf32> to vector<8x128xf32>
    %38 = arith.addf %35, %37 : vector<8x128xf32>
    %cst_28 = arith.constant dense<0xFF800000> : vector<8xf32>
    %39 = vector.multi_reduction <maximumf>, %38, %cst_28 [1] : vector<8x128xf32> to vector<8xf32>
    %40 = vector.shape_cast %39 : vector<8xf32> to vector<8x1xf32>
    %41 = vector.broadcast %40 : vector<8x1xf32> to vector<8x128xf32>
    %42 = arith.subf %38, %41 : vector<8x128xf32>
    %43 = math.exp %42 : vector<8x128xf32>
    %cst_29 = arith.constant dense<0.000000e+00> : vector<8xf32>
    %44 = vector.multi_reduction <add>, %43, %cst_29 [1] : vector<8x128xf32> to vector<8xf32>
    %45 = vector.shape_cast %44 : vector<8xf32> to vector<8x1xf32>
    %46 = math.log %45 : vector<8x1xf32>
    %47 = vector.broadcast %46 : vector<8x1xf32> to vector<8x128xf32>
    %48 = arith.subf %42, %47 : vector<8x128xf32>
    %c0_30 = arith.constant 0 : index
    %c0_31 = arith.constant 0 : index
    %49 = vector.load %arg12[%c0_30, %c0_31] : memref<8x384xf32, #tpu.memory_space<vmem>>, vector<8x128xf32>
    tpu.vector_store %arg12[%c0_30, %c0_31], %32 {strides = array<i32>} : memref<8x384xf32, #tpu.memory_space<vmem>>, vector<8x128xf32>,
    %c0_32 = arith.constant 0 : index
    %c128 = arith.constant 128 : index
    %50 = vector.load %arg12[%c0_32, %c128] : memref<8x384xf32, #tpu.memory_space<vmem>>, vector<8x128xf32>
    tpu.vector_store %arg12[%c0_32, %c128], %48 {strides = array<i32>} : memref<8x384xf32, #tpu.memory_space<vmem>>, vector<8x128xf32>,
    %c0_33 = arith.constant 0 : index
    %c256 = arith.constant 256 : index
    %51 = vector.load %arg12[%c0_33, %c256] : memref<8x384xf32, #tpu.memory_space<vmem>>, vector<8x128xf32>
    tpu.vector_store %arg12[%c0_33, %c256], %38 {strides = array<i32>} : memref<8x384xf32, #tpu.memory_space<vmem>>, vector<8x128xf32>,
    return
  }
  func.func @transform_0(%arg0: i32) -> (i32, i32) {
    %c0_i32 = arith.constant 0 : i32
    %c0_i32_0 = arith.constant 0 : i32
    return %arg0, %c0_i32 : i32, i32
  }
  func.func @transform_1(%arg0: i32) -> (i32, i32) {
    %c0_i32 = arith.constant 0 : i32
    %c0_i32_0 = arith.constant 0 : i32
    %c0_i32_1 = arith.constant 0 : i32
    return %c0_i32, %c0_i32_0 : i32, i32
  }
  func.func @transform_2(%arg0: i32) -> (i32, i32) {
    %c0_i32 = arith.constant 0 : i32
    %c0_i32_0 = arith.constant 0 : i32
    %c0_i32_1 = arith.constant 0 : i32
    return %c0_i32, %c0_i32_0 : i32, i32
  }
  func.func @transform_3(%arg0: i32) -> (i32, i32) {
    %c0_i32 = arith.constant 0 : i32
    %c0_i32_0 = arith.constant 0 : i32
    %c0_i32_1 = arith.constant 0 : i32
    return %c0_i32, %c0_i32_0 : i32, i32
  }
  func.func @transform_4(%arg0: i32) -> (i32, i32) {
    %c0_i32 = arith.constant 0 : i32
    %c0_i32_0 = arith.constant 0 : i32
    %c0_i32_1 = arith.constant 0 : i32
    return %c0_i32, %c0_i32_0 : i32, i32
  }
  func.func @transform_5(%arg0: i32) -> (i32, i32) {
    %c0_i32 = arith.constant 0 : i32
    %c0_i32_0 = arith.constant 0 : i32
    %c0_i32_1 = arith.constant 0 : i32
    return %c0_i32, %c0_i32_0 : i32, i32
  }
  func.func @transform_6(%arg0: i32) -> (i32, i32) {
    %c0_i32 = arith.constant 0 : i32
    %c0_i32_0 = arith.constant 0 : i32
    %c0_i32_1 = arith.constant 0 : i32
    return %c0_i32, %c0_i32_0 : i32, i32
  }
  func.func @transform_7(%arg0: i32) -> (i32, i32) {
    %c0_i32 = arith.constant 0 : i32
    %c0_i32_0 = arith.constant 0 : i32
    %c0_i32_1 = arith.constant 0 : i32
    return %c0_i32, %c0_i32_0 : i32, i32
  }
  func.func @transform_8(%arg0: i32) -> (i32, i32) {
    %c0_i32 = arith.constant 0 : i32
    %c0_i32_0 = arith.constant 0 : i32
    %c0_i32_1 = arith.constant 0 : i32
    return %c0_i32, %c0_i32_0 : i32, i32
  }
  func.func @transform_9(%arg0: i32) -> (i32, i32) {
    %c0_i32 = arith.constant 0 : i32
    %c0_i32_0 = arith.constant 0 : i32
    %c0_i32_1 = arith.constant 0 : i32
    return %c0_i32, %c0_i32_0 : i32, i32
  }
  func.func @transform_10(%arg0: i32) -> (i32, i32) {
    %c0_i32 = arith.constant 0 : i32
    %c0_i32_0 = arith.constant 0 : i32
    %c0_i32_1 = arith.constant 0 : i32
    return %c0_i32, %c0_i32_0 : i32, i32
  }
  func.func @transform_11(%arg0: i32) -> (i32, i32) {
    %c0_i32 = arith.constant 0 : i32
    %c0_i32_0 = arith.constant 0 : i32
    return %arg0, %c0_i32 : i32, i32
  }
}

</mosaic_0001>

<bundles_post_ra>
// kernel: tpu_custom_call.1
= control target key start
LH: loop header
LB: loop body
LE: loop exit
PB: predicated region body
PF: predicated region fallthrough
CT: control target
= control target key end

     0   :  { %16 = vsyncpa [#allocation3], 0  ;;  %s1927_s0 = inlined_call_operand.hbm [shape: f32[8,8], index: 0, kind: input, shape index: {}]   ;;  %s1928_s1 = inlined_call_operand.hbm [shape: bf16[8,512], index: 1, kind: input, shape index: {}]   ;;  %s1929_s2 = inlined_call_operand.hbm [shape: f32[1,512], index: 2, kind: input, shape index: {}]   ;;  %s1930_s3 = inlined_call_operand.hbm [shape: bf16[256,256], index: 3, kind: input, shape index: {}]   ;;  %s1931_s4 = inlined_call_operand.vmem [shape: f32[1,256], index: 4, kind: input, shape index: {}]   ;;  %s1932_s5 = inlined_call_operand.hbm [shape: bf16[256,256], index: 5, kind: input, shape index: {}]   ;;  %s1933_s6 = inlined_call_operand.vmem [shape: f32[1,256], index: 6, kind: input, shape index: {}]   ;;  %s1934_s7 = inlined_call_operand.hbm [shape: bf16[256,128], index: 7, kind: input, shape index: {}]   ;;  %s1935_s8 = inlined_call_operand.vmem [shape: f32[1,128], index: 8, kind: input, shape index: {}]   ;;  %s1936_s9 = inlined_call_operand.hbm [shape: bf16[256,128], index: 9, kind: input, shape index: {}]   ;;  %s1937_s10 = inlined_call_operand.vmem [shape: f32[1,128], index: 10, kind: input, shape index: {}]   ;;  %s1938_s11 = inlined_call_operand.hbm [shape: f32[8,384], index: 11, kind: output, shape index: {}]  }
   0x1   :  { %17 = vsyncpa [#allocation6], 0 }
   0x2   :  { %18 = vsyncpa [#allocation9], 0 }
   0x3   :  { %19 = vsyncpa [#allocation12], 0  ;;  %s37_s19 = sshll.u32 %s1928_s1, 4  ;;  %s38_s19 = int_to_ptr.hbm [resolvable:$true] %s37_s19 }
   0x4   :  { %20 = vsyncpa [#allocation4], 0  ;;  %s1805_s20 = smov [#allocation5]   ;;  %s58_s24 = sshll.u32 %s1930_s3, 4  ;;  %s59_s24 = int_to_ptr.hbm [resolvable:$true] %s58_s24 }
   0x5   :  { %s39_s21 = sshll.u32 %s1805_s20, 4  ;;  %s1806_s25 = smov [#allocation8]   ;;  %s40_s21 = int_to_ptr.vmem [resolvable:$true] %s39_s21 }
   0x6   :  { %42 = dma.hbm_to_vmem [thread:$0]  %s38_s19, 256, %s40_s21, [#allocation6]  }
   0x7   :  { %s60_s26 = sshll.u32 %s1806_s25, 4  ;;  %s1807_s27 = smov 128   ;;  %s61_s26 = int_to_ptr.vmem [resolvable:$true] %s60_s26 }
   0x8   :  { %s1808_s28 = smov 8   ;;  %s88_s30 = sshll.u32 %s1934_s7, 4  ;;  %s89_s30 = int_to_ptr.hbm [resolvable:$true] %s88_s30 }
   0x9   :  { %66 = dma.hbm_to_vmem [thread:$0]  %s59_s24, 4096, %s61_s26, [#allocation9], %s1807_s27, %s1807_s27, %s1808_s28  }
   0xa   :  { %s1809_s12 = smov [#allocation11]   ;;  %s26_s15 = sshll.u32 %s1927_s0, 4  ;;  %s27_s15 = int_to_ptr.hbm [resolvable:$true] %s26_s15 }
   0xb   :  { %s90_s13 = sshll.u32 %s1809_s12, 4  ;;  %s1810_s16 = smov 64   ;;  %s91_s13 = int_to_ptr.vmem [resolvable:$true] %s90_s13 }
   0xc   :  { %s1811_s17 = smov 4   ;;  %s1812_s18 = smov [#allocation2]  }
   0xd   :  { %96 = dma.hbm_to_vmem [thread:$0]  %s89_s30, 2048, %s91_s13, [#allocation12], %s1810_s16, %s1810_s16, %s1811_s17  }
   0xe   :  { %s28_s19 = sshll.u32 %s1812_s18, 4  ;;  %s48_s22 = sshll.u32 %s1929_s2, 4  ;;  %s29_s19 = int_to_ptr.vmem [resolvable:$true] %s28_s19  ;;  %s49_s22 = int_to_ptr.hbm [resolvable:$true] %s48_s22 }
   0xf   :  { %31 = dma.hbm_to_vmem [thread:$0]  %s27_s15, 128, %s29_s19, [#allocation3]  }
  0x10   :  { %s73_s24 = sshll.u32 %s1932_s5, 4  ;;  %s1813_s25 = smov [#allocation7]   ;;  %s74_s24 = int_to_ptr.hbm [resolvable:$true] %s73_s24 }
  0x11   :  { %s50_s26 = sshll.u32 %s1813_s25, 4  ;;  %s1814_s0 = smov [#allocation10]   ;;  %s51_s26 = int_to_ptr.vmem [resolvable:$true] %s50_s26 }
  0x12   :  { %53 = dma.hbm_to_vmem [thread:$0]  %s49_s22, 64, %s51_s26, [#allocation6]  }
  0x13   :  { %s75_s1 = sshll.u32 %s1814_s0, 4  ;;  %s103_s12 = sshll.u32 %s1936_s9, 4  ;;  %s76_s1 = int_to_ptr.vmem [resolvable:$true] %s75_s1  ;;  %s104_s12 = int_to_ptr.hbm [resolvable:$true] %s103_s12 }
  0x14   :  { %81 = dma.hbm_to_vmem [thread:$0]  %s74_s24, 4096, %s76_s1, [#allocation9], %s1807_s27, %s1807_s27, %s1808_s28  }
  0x15   :  { %s1815_s2 = smov [#allocation13]  }
  0x16   :  { %s105_s13 = sshll.u32 %s1815_s2, 4  ;;  %s106_s13 = int_to_ptr.vmem [resolvable:$true] %s105_s13 }
  0x17   :  { %111 = dma.hbm_to_vmem [thread:$0]  %s104_s12, 2048, %s106_s13, [#allocation12], %s1810_s16, %s1810_s16, %s1811_s17  }
  0x18   :  { %1795 = dma.done.wait [#allocation3], 128  }
  0x19   :  { %1796 = vsyncadd [#allocation3], 4294967168 }
  0x1a   :  { %1797 = dma.done.wait [#allocation6], 320  }
  0x1b   :  { %1798 = vsyncadd [#allocation6], 4294966976 }
  0x1c   :  { %1799 = dma.done.wait [#allocation9], 8192  }
  0x1d   :  { %1800 = vsyncadd [#allocation9], 4294959104 }
  0x1e   :  { %1801 = dma.done.wait [#allocation12], 4096  }
  0x1f   :  { %1802 = vsyncadd [#allocation12], 4294963200  ;;  %v145_v0 = vld [vmem:[#allocation5] sm:$0xff]  ;;  %v146_v1 = vld [vmem:[#allocation5 + $0x8] sm:$0xff]  ;;  %vm171_vm0 = vcmask 1043456   ;;  %vm167_vm1 = vcmask 64512  }
  0x20   :  { %v159_v2 = vunpack.c.l.b16 %v145_v0  ;;  %v160_v3 = vunpack.c.h.b16 %v145_v0  ;;  %v161_v4 = vunpack.c.l.b16 %v146_v1  ;;  %v1163_v5 = vld [vmem:[#allocation8 + $0x70] sm:$0xf]  ;;  %v1504_v6 = vld [vmem:[#allocation8 + $0x74] sm:$0xf0]  ;;  %v143_v8 = vld [vmem:[#allocation2] sm:$0xff]  ;;  %v162_v9 = vunpack.c.h.b16 %v146_v1  ;;  %s1088_s17 = sshll.u32 %s1938_s11, 4  ;;  %s1089_s17 = int_to_ptr.hbm [resolvable:$true] %s1088_s17 }
  0x21   :  { %v1227_v7 = vld [vmem:[#allocation8 + $0xf0] sm:$0xf]  ;;  %v1520_v10 = vld [vmem:[#allocation8 + $0xf4] sm:$0xf0]  ;;  %v1503_v11 = vld [vmem:[#allocation8 + $0x74] sm:$0xf]  ;;  %v1164_v19 = vor.u32 %v1504_v6, %v1163_v5  ;;  %v144_v27 = vpack.c.bf16 %v143_v8, %v143_v8 }
  0x22   :  { %v163_v12 = vpack.c.b16 %v159_v2, %v159_v2  ;;  %v164_v13 = vpack.c.b16 %v160_v3, %v160_v3  ;;  %v165_v14 = vpack.c.b16 %v161_v4, %v161_v4  ;;  %v1165_v15 = vld [vmem:[#allocation8 + $0x78] sm:$0xf0]  ;;  %v1519_v16 = vld [vmem:[#allocation8 + $0xf4] sm:$0xf]  ;;  %v166_v18 = vpack.c.b16 %v162_v9, %v162_v9  ;;  %v1155_v21 = vld [vmem:[#allocation8 + $0x60] sm:$0xf] }
  0x23   :  { %v1229_v17 = vld [vmem:[#allocation8 + $0xf8] sm:$0xf0]  ;;  %v1228_v20 = vor.u32 %v1520_v10, %v1227_v7  ;;  %v1502_v22 = vld [vmem:[#allocation8 + $0x64] sm:$0xf0]  ;;  %v1219_v23 = vld [vmem:[#allocation8 + $0xe0] sm:$0xf]  ;;  %v1168_v30 = vor.u32 %v1503_v11, %v1165_v15 }
  0x24   :  { %v173_v24 = vsel %vm171_vm0, %v163_v12, 0  ;;  %v176_v25 = vsel %vm171_vm0, %v164_v13, 0  ;;  %v179_v26 = vsel %vm171_vm0, %v165_v14, 0  ;;  %v1518_v28 = vld [vmem:[#allocation8 + $0xe4] sm:$0xf0]  ;;  %v182_v29 = vsel %vm171_vm0, %v166_v18, 0 }
  0x25   :  { %191 = vmatpush.bf16.msra.mxu0 %v173_v24  ;;  %204 = vmatpush.bf16.msra.mxu1 %v176_v25  ;;  %v1232_v31 = vor.u32 %v1519_v16, %v1229_v17  ;;  %v1501_v32 = vld [vmem:[#allocation8 + $0x64] sm:$0xf]  ;;  %v1157_v33 = vld [vmem:[#allocation8 + $0x68] sm:$0xf0]  ;;  %v1156_v34 = vor.u32 %v1502_v22, %v1155_v21  ;;  %v1220_v35 = vor.u32 %v1518_v28, %v1219_v23  ;;  %v1147_v38 = vld [vmem:[#allocation8 + $0x50] sm:$0xf] }
  0x26   :  { %217 = vmatpush.bf16.msra.mxu2 %v179_v26  ;;  %230 = vmatpush.bf16.msra.mxu3 %v182_v29  ;;  %v1517_v36 = vld [vmem:[#allocation8 + $0xe4] sm:$0xf]  ;;  %v1221_v37 = vld [vmem:[#allocation8 + $0xe8] sm:$0xf0]  ;;  %v1500_v39 = vld [vmem:[#allocation8 + $0x54] sm:$0xf0]  ;;  %v1160_v42 = vor.u32 %v1501_v32, %v1157_v33 }
  0x27   :  { %v1211_v40 = vld [vmem:[#allocation8 + $0xd0] sm:$0xf]  ;;  %v1516_v41 = vld [vmem:[#allocation8 + $0xd4] sm:$0xf0]  ;;  %v1224_v43 = vor.u32 %v1517_v36, %v1221_v37  ;;  %v1499_v44 = vld [vmem:[#allocation8 + $0x54] sm:$0xf]  ;;  %v1148_v46 = vor.u32 %v1500_v39, %v1147_v38 }
  0x28   :  { %1101 = vmatmul.msk.bf16.vlgmr.msra.gmra.mxu0 %vm167_vm1, %v144_v27  ;;  %1102 = vmatmul.msk.bf16.vlgmr.msra.gmra.mxu1 %vm167_vm1, %v144_v27  ;;  %v1149_v45 = vld [vmem:[#allocation8 + $0x58] sm:$0xf0]  ;;  %v1212_v47 = vor.u32 %v1516_v41, %v1211_v40  ;;  %v1515_v48 = vld [vmem:[#allocation8 + $0xd4] sm:$0xf]  ;;  %v1139_v50 = vld [vmem:[#allocation8 + $0x40] sm:$0xf] }
  0x29   :  { %442 = vmatpush.bf16.msrb.mxu0 %v1164_v19  ;;  %455 = vmatpush.bf16.msrb.mxu1 %v1228_v20  ;;  %v1213_v49 = vld [vmem:[#allocation8 + $0xd8] sm:$0xf0]  ;;  %v1498_v51 = vld [vmem:[#allocation8 + $0x44] sm:$0xf0]  ;;  %v1203_v52 = vld [vmem:[#allocation8 + $0xc0] sm:$0xf]  ;;  %v1152_v54 = vor.u32 %v1499_v44, %v1149_v45 }
  0x2a   :  { %1103 = vmatmul.msk.bf16.vlgmr.msra.gmra.mxu2 %vm167_vm1, %v144_v27  ;;  %1104 = vmatmul.msk.bf16.vlgmr.msra.gmra.mxu3 %vm167_vm1, %v144_v27  ;;  %v1514_v53 = vld [vmem:[#allocation8 + $0xc4] sm:$0xf0]  ;;  %v1216_v55 = vor.u32 %v1515_v48, %v1213_v49  ;;  %v1497_v56 = vld [vmem:[#allocation8 + $0x44] sm:$0xf]  ;;  %v1141_v57 = vld [vmem:[#allocation8 + $0x48] sm:$0xf0]  ;;  %v1140_v58 = vor.u32 %v1498_v51, %v1139_v50 }
  0x2b   :  { %468 = vmatpush.bf16.msrb.mxu2 %v1168_v30  ;;  %481 = vmatpush.bf16.msrb.mxu3 %v1232_v31  ;;  %v1204_v59 = vor.u32 %v1514_v53, %v1203_v52  ;;  %v1513_v60 = vld [vmem:[#allocation8 + $0xc4] sm:$0xf]  ;;  %v1205_v61 = vld [vmem:[#allocation8 + $0xc8] sm:$0xf0]  ;;  %v1131_v62 = vld [vmem:[#allocation8 + $0x30] sm:$0xf]  ;;  %v1144_v2 = vor.u32 %v1497_v56, %v1141_v57 }
  0x2c   :  { %v1496_v63 = vld [vmem:[#allocation8 + $0x34] sm:$0xf0]  ;;  %v1195_v0 = vld [vmem:[#allocation8 + $0xb0] sm:$0xf]  ;;  %v1208_v3 = vor.u32 %v1513_v60, %v1205_v61  ;;  %v1495_v4 = vld [vmem:[#allocation8 + $0x34] sm:$0xf] }
  0x2d   :  { %443 = vmatpush.bf16.msrb.mxu0 %v1156_v34  ;;  %456 = vmatpush.bf16.msrb.mxu1 %v1220_v35  ;;  %v1512_v1 = vld [vmem:[#allocation8 + $0xb4] sm:$0xf0]  ;;  %v1133_v5 = vld [vmem:[#allocation8 + $0x38] sm:$0xf0]  ;;  %v1132_v6 = vor.u32 %v1496_v63, %v1131_v62  ;;  %v1511_v8 = vld [vmem:[#allocation8 + $0xb4] sm:$0xf] }
  0x2e   :  { %v1196_v7 = vor.u32 %v1512_v1, %v1195_v0  ;;  %v1197_v9 = vld [vmem:[#allocation8 + $0xb8] sm:$0xf0]  ;;  %v1123_v10 = vld [vmem:[#allocation8 + $0x20] sm:$0xf]  ;;  %v1494_v11 = vld [vmem:[#allocation8 + $0x24] sm:$0xf0]  ;;  %v1136_v14 = vor.u32 %v1495_v4, %v1133_v5 }
  0x2f   :  { %469 = vmatpush.bf16.msrb.mxu2 %v1160_v42  ;;  %482 = vmatpush.bf16.msrb.mxu3 %v1224_v43  ;;  %v1187_v12 = vld [vmem:[#allocation8 + $0xa0] sm:$0xf]  ;;  %v1510_v13 = vld [vmem:[#allocation8 + $0xa4] sm:$0xf0]  ;;  %v1200_v15 = vor.u32 %v1511_v8, %v1197_v9  ;;  %v1493_v16 = vld [vmem:[#allocation8 + $0x24] sm:$0xf]  ;;  %v1124_v18 = vor.u32 %v1494_v11, %v1123_v10 }
  0x30   :  { %v1125_v17 = vld [vmem:[#allocation8 + $0x28] sm:$0xf0]  ;;  %v1188_v19 = vor.u32 %v1510_v13, %v1187_v12  ;;  %v1509_v20 = vld [vmem:[#allocation8 + $0xa4] sm:$0xf]  ;;  %v1115_v22 = vld [vmem:[#allocation8 + $0x10] sm:$0xf] }
  0x31   :  { %444 = vmatpush.bf16.msrb.mxu0 %v1148_v46  ;;  %457 = vmatpush.bf16.msrb.mxu1 %v1212_v47  ;;  %v1189_v21 = vld [vmem:[#allocation8 + $0xa8] sm:$0xf0]  ;;  %v1492_v23 = vld [vmem:[#allocation8 + $0x14] sm:$0xf0]  ;;  %v1179_v24 = vld [vmem:[#allocation8 + $0x90] sm:$0xf]  ;;  %v1128_v28 = vor.u32 %v1493_v16, %v1125_v17 }
  0x32   :  { %v1508_v25 = vld [vmem:[#allocation8 + $0x94] sm:$0xf0]  ;;  %v1491_v26 = vld [vmem:[#allocation8 + $0x14] sm:$0xf]  ;;  %v1117_v27 = vld [vmem:[#allocation8 + $0x18] sm:$0xf0]  ;;  %v1192_v29 = vor.u32 %v1509_v20, %v1189_v21  ;;  %v1116_v33 = vor.u32 %v1492_v23, %v1115_v22 }
  0x33   :  { %470 = vmatpush.bf16.msrb.mxu2 %v1152_v54  ;;  %483 = vmatpush.bf16.msrb.mxu3 %v1216_v55  ;;  %v1507_v30 = vld [vmem:[#allocation8 + $0x94] sm:$0xf]  ;;  %v1181_v31 = vld [vmem:[#allocation8 + $0x98] sm:$0xf0]  ;;  %v1107_v32 = vld [vmem:[#allocation8] sm:$0xf]  ;;  %v1180_v34 = vor.u32 %v1508_v25, %v1179_v24  ;;  %v1120_v42 = vor.u32 %v1491_v26, %v1117_v27 }
  0x34   :  { %v1490_v35 = vld [vmem:[#allocation8 + $0x4] sm:$0xf0]  ;;  %v1171_v36 = vld [vmem:[#allocation8 + $0x80] sm:$0xf]  ;;  %v1291_v38 = vld [vmem:[#allocation10 + $0x70] sm:$0xf]  ;;  %v1184_v43 = vor.u32 %v1507_v30, %v1181_v31 }
  0x35   :  { %445 = vmatpush.bf16.msrb.mxu0 %v1140_v58  ;;  %458 = vmatpush.bf16.msrb.mxu1 %v1204_v59  ;;  %v1506_v37 = vld [vmem:[#allocation8 + $0x84] sm:$0xf0]  ;;  %v1536_v39 = vld [vmem:[#allocation10 + $0x74] sm:$0xf0]  ;;  %v1355_v40 = vld [vmem:[#allocation10 + $0xf0] sm:$0xf]  ;;  %v1108_v47 = vor.u32 %v1490_v35, %v1107_v32 }
  0x36   :  { %v1552_v41 = vld [vmem:[#allocation10 + $0xf4] sm:$0xf0]  ;;  %v1489_v44 = vld [vmem:[#allocation8 + $0x4] sm:$0xf]  ;;  %v1109_v45 = vld [vmem:[#allocation8 + $0x8] sm:$0xf0]  ;;  %v1172_v48 = vor.u32 %v1506_v37, %v1171_v36  ;;  %v1292_v52 = vor.u32 %v1536_v39, %v1291_v38 }
  0x37   :  { %471 = vmatpush.bf16.msrb.mxu2 %v1144_v2  ;;  %484 = vmatpush.bf16.msrb.mxu3 %v1208_v3  ;;  %v1505_v46 = vld [vmem:[#allocation8 + $0x84] sm:$0xf]  ;;  %v1173_v49 = vld [vmem:[#allocation8 + $0x88] sm:$0xf0]  ;;  %v1535_v50 = vld [vmem:[#allocation10 + $0x74] sm:$0xf]  ;;  %v1356_v53 = vor.u32 %v1552_v41, %v1355_v40  ;;  %v1112_v60 = vor.u32 %v1489_v44, %v1109_v45 }
  0x38   :  { %v1293_v51 = vld [vmem:[#allocation10 + $0x78] sm:$0xf0]  ;;  %v1551_v54 = vld [vmem:[#allocation10 + $0xf4] sm:$0xf]  ;;  %v1283_v56 = vld [vmem:[#allocation10 + $0x60] sm:$0xf]  ;;  %v1176_v61 = vor.u32 %v1505_v46, %v1173_v49 }
  0x39   :  { %446 = vmatpush.bf16.msrb.mxu0 %v1132_v6  ;;  %459 = vmatpush.bf16.msrb.mxu1 %v1196_v7  ;;  %v1357_v55 = vld [vmem:[#allocation10 + $0xf8] sm:$0xf0]  ;;  %v1534_v57 = vld [vmem:[#allocation10 + $0x64] sm:$0xf0]  ;;  %v1347_v58 = vld [vmem:[#allocation10 + $0xe0] sm:$0xf]  ;;  %v1296_v62 = vor.u32 %v1535_v50, %v1293_v51 }
  0x3a   :  { %v1550_v59 = vld [vmem:[#allocation10 + $0xe4] sm:$0xf0]  ;;  %v1360_v63 = vor.u32 %v1551_v54, %v1357_v55  ;;  %v1533_v0 = vld [vmem:[#allocation10 + $0x64] sm:$0xf]  ;;  %v1284_v1 = vor.u32 %v1534_v57, %v1283_v56  ;;  %v1285_v3 = vld [vmem:[#allocation10 + $0x68] sm:$0xf0] }
  0x3b   :  { %472 = vmatpush.bf16.msrb.mxu2 %v1136_v14  ;;  %485 = vmatpush.bf16.msrb.mxu3 %v1200_v15  ;;  %v1348_v2 = vor.u32 %v1550_v59, %v1347_v58  ;;  %v1549_v4 = vld [vmem:[#allocation10 + $0xe4] sm:$0xf]  ;;  %v1349_v5 = vld [vmem:[#allocation10 + $0xe8] sm:$0xf0]  ;;  %v1288_v6 = vor.u32 %v1533_v0, %v1285_v3  ;;  %v1275_v8 = vld [vmem:[#allocation10 + $0x50] sm:$0xf] }
  0x3c   :  { %v1352_v7 = vor.u32 %v1549_v4, %v1349_v5  ;;  %v1532_v9 = vld [vmem:[#allocation10 + $0x54] sm:$0xf0]  ;;  %v1339_v10 = vld [vmem:[#allocation10 + $0xd0] sm:$0xf]  ;;  %v1531_v13 = vld [vmem:[#allocation10 + $0x54] sm:$0xf] }
  0x3d   :  { %447 = vmatpush.bf16.msrb.mxu0 %v1124_v18  ;;  %460 = vmatpush.bf16.msrb.mxu1 %v1188_v19  ;;  %v1276_v11 = vor.u32 %v1532_v9, %v1275_v8  ;;  %v1548_v12 = vld [vmem:[#allocation10 + $0xd4] sm:$0xf0]  ;;  %v1277_v14 = vld [vmem:[#allocation10 + $0x58] sm:$0xf0]  ;;  %v1547_v17 = vld [vmem:[#allocation10 + $0xd4] sm:$0xf] }
  0x3e   :  { %v1340_v15 = vor.u32 %v1548_v12, %v1339_v10  ;;  %v1280_v16 = vor.u32 %v1531_v13, %v1277_v14  ;;  %v1341_v18 = vld [vmem:[#allocation10 + $0xd8] sm:$0xf0]  ;;  %v1267_v20 = vld [vmem:[#allocation10 + $0x40] sm:$0xf]  ;;  %v1530_v21 = vld [vmem:[#allocation10 + $0x44] sm:$0xf0] }
  0x3f   :  { %473 = vmatpush.bf16.msrb.mxu2 %v1128_v28  ;;  %486 = vmatpush.bf16.msrb.mxu3 %v1192_v29  ;;  %v1344_v19 = vor.u32 %v1547_v17, %v1341_v18  ;;  %v1331_v22 = vld [vmem:[#allocation10 + $0xc0] sm:$0xf]  ;;  %v1268_v23 = vor.u32 %v1530_v21, %v1267_v20  ;;  %v1546_v24 = vld [vmem:[#allocation10 + $0xc4] sm:$0xf0]  ;;  %v1529_v25 = vld [vmem:[#allocation10 + $0x44] sm:$0xf] }
  0x40   :  { %v1269_v26 = vld [vmem:[#allocation10 + $0x48] sm:$0xf0]  ;;  %v1332_v27 = vor.u32 %v1546_v24, %v1331_v22  ;;  %v1545_v29 = vld [vmem:[#allocation10 + $0xc4] sm:$0xf]  ;;  %v1259_v32 = vld [vmem:[#allocation10 + $0x30] sm:$0xf] }
  0x41   :  { %448 = vmatpush.bf16.msrb.mxu0 %v1116_v33  ;;  %461 = vmatpush.bf16.msrb.mxu1 %v1180_v34  ;;  %v1272_v28 = vor.u32 %v1529_v25, %v1269_v26  ;;  %v1333_v30 = vld [vmem:[#allocation10 + $0xc8] sm:$0xf0]  ;;  %v1528_v33 = vld [vmem:[#allocation10 + $0x34] sm:$0xf0]  ;;  %v1323_v34 = vld [vmem:[#allocation10 + $0xb0] sm:$0xf] }
  0x42   :  { %v1336_v31 = vor.u32 %v1545_v29, %v1333_v30  ;;  %v1260_v35 = vor.u32 %v1528_v33, %v1259_v32  ;;  %v1544_v36 = vld [vmem:[#allocation10 + $0xb4] sm:$0xf0]  ;;  %v1527_v37 = vld [vmem:[#allocation10 + $0x34] sm:$0xf]  ;;  %v1261_v38 = vld [vmem:[#allocation10 + $0x38] sm:$0xf0] }
  0x43   :  { %474 = vmatpush.bf16.msrb.mxu2 %v1120_v42  ;;  %487 = vmatpush.bf16.msrb.mxu3 %v1184_v43  ;;  %v1324_v39 = vor.u32 %v1544_v36, %v1323_v34  ;;  %v1264_v40 = vor.u32 %v1527_v37, %v1261_v38  ;;  %v1543_v41 = vld [vmem:[#allocation10 + $0xb4] sm:$0xf]  ;;  %v1325_v42 = vld [vmem:[#allocation10 + $0xb8] sm:$0xf0]  ;;  %v1251_v44 = vld [vmem:[#allocation10 + $0x20] sm:$0xf] }
  0x44   :  { %v1328_v43 = vor.u32 %v1543_v41, %v1325_v42  ;;  %v1526_v45 = vld [vmem:[#allocation10 + $0x24] sm:$0xf0]  ;;  %v1315_v46 = vld [vmem:[#allocation10 + $0xa0] sm:$0xf]  ;;  %v1525_v49 = vld [vmem:[#allocation10 + $0x24] sm:$0xf] }
  0x45   :  { %449 = vmatpush.bf16.msrb.mxu0 %v1108_v47  ;;  %462 = vmatpush.bf16.msrb.mxu1 %v1172_v48  ;;  %v1252_v47 = vor.u32 %v1526_v45, %v1251_v44  ;;  %v1542_v48 = vld [vmem:[#allocation10 + $0xa4] sm:$0xf0]  ;;  %v1253_v50 = vld [vmem:[#allocation10 + $0x28] sm:$0xf0]  ;;  %v1243_v56 = vld [vmem:[#allocation10 + $0x10] sm:$0xf] }
  0x46   :  { %v1316_v51 = vor.u32 %v1542_v48, %v1315_v46  ;;  %v1317_v54 = vld [vmem:[#allocation10 + $0xa8] sm:$0xf0]  ;;  %v1524_v57 = vld [vmem:[#allocation10 + $0x14] sm:$0xf0]  ;;  %v1307_v58 = vld [vmem:[#allocation10 + $0x90] sm:$0xf] }
  0x47   :  { %475 = vmatpush.bf16.msrb.mxu2 %v1112_v60  ;;  %488 = vmatpush.bf16.msrb.mxu3 %v1176_v61  ;;  %v1244_v59 = vor.u32 %v1524_v57, %v1243_v56  ;;  %v1540_v60 = vld [vmem:[#allocation10 + $0x94] sm:$0xf0]  ;;  %v1523_v61 = vld [vmem:[#allocation10 + $0x14] sm:$0xf]  ;;  %v1235_v3 = vld [vmem:[#allocation10] sm:$0xf] }
  0x48   :  { %v1522_v5 = vld [vmem:[#allocation10 + $0x4] sm:$0xf0]  ;;  %v1521_v10 = vld [vmem:[#allocation10 + $0x4] sm:$0xf]  ;;  %v1301_v14 = vld [vmem:[#allocation10 + $0x88] sm:$0xf0] }
  0x49   :  { %694 = vmatpush.bf16.msra.mxu0 %v1292_v52  ;;  %707 = vmatpush.bf16.msra.mxu1 %v1356_v53  ;;  %v1256_v52 = vor.u32 %v1525_v49, %v1253_v50  ;;  %v1541_v53 = vld [vmem:[#allocation10 + $0xa4] sm:$0xf]  ;;  %v1236_v8 = vor.u32 %v1522_v5, %v1235_v3  ;;  %v1576_v29 = vld [vmem:[#allocation13 + $0x38] sm:$0xff]  ;;  %v1559_v36 = vld [vmem:[#allocation11 + $0x30] sm:$0xff] }
  0x4a   :  { %v1320_v55 = vor.u32 %v1541_v53, %v1317_v54  ;;  %v1537_v12 = vld [vmem:[#allocation10 + $0x84] sm:$0xf]  ;;  %v1567_v37 = vld [vmem:[#allocation11 + $0x70] sm:$0xff]  ;;  %v1558_v41 = vld [vmem:[#allocation11 + $0x28] sm:$0xff] }
  0x4b   :  { %720 = vmatpush.bf16.msra.mxu2 %v1296_v62  ;;  %733 = vmatpush.bf16.msra.mxu3 %v1360_v63  ;;  %v1245_v62 = vld [vmem:[#allocation10 + $0x18] sm:$0xf0]  ;;  %v1308_v63 = vor.u32 %v1540_v60, %v1307_v58  ;;  %v1575_v38 = vld [vmem:[#allocation13 + $0x30] sm:$0xff]  ;;  %v1566_v42 = vld [vmem:[#allocation11 + $0x68] sm:$0xff] }
  0x4c   :  { %v1248_v0 = vor.u32 %v1523_v61, %v1245_v62  ;;  %v1565_v48 = vld [vmem:[#allocation11 + $0x60] sm:$0xff]  ;;  %v1564_v53 = vld [vmem:[#allocation11 + $0x58] sm:$0xff]  ;;  %v1574_v56 = vld [vmem:[#allocation13 + $0x28] sm:$0xff] }
  0x4d   :  { %695 = vmatpush.bf16.msra.mxu0 %v1284_v1  ;;  %708 = vmatpush.bf16.msra.mxu1 %v1348_v2  ;;  %v1539_v1 = vld [vmem:[#allocation10 + $0x94] sm:$0xf]  ;;  %v1309_v2 = vld [vmem:[#allocation10 + $0x98] sm:$0xf0]  ;;  %v1573_v60 = vld [vmem:[#allocation13 + $0x20] sm:$0xff] }
  0x4e   :  { %v1312_v4 = vor.u32 %v1539_v1, %v1309_v2  ;;  %v1584_v54 = vld [vmem:[#allocation13 + $0x78] sm:$0xff]  ;;  %v1563_v57 = vld [vmem:[#allocation11 + $0x50] sm:$0xff]  ;;  %v1562_v61 = vld [vmem:[#allocation11 + $0x48] sm:$0xff] }
  0x4f   :  { %721 = vmatpush.bf16.msra.mxu2 %v1288_v6  ;;  %734 = vmatpush.bf16.msra.mxu3 %v1352_v7  ;;  %v1299_v6 = vld [vmem:[#allocation10 + $0x80] sm:$0xf]  ;;  %v1538_v7 = vld [vmem:[#allocation10 + $0x84] sm:$0xf0]  ;;  %v1583_v58 = vld [vmem:[#allocation13 + $0x70] sm:$0xff] }
  0x50   :  { %v1300_v9 = vor.u32 %v1538_v7, %v1299_v6  ;;  %v1582_v62 = vld [vmem:[#allocation13 + $0x68] sm:$0xff]  ;;  %v1581_v1 = vld [vmem:[#allocation13 + $0x60] sm:$0xff]  ;;  %v1571_v2 = vld [vmem:[#allocation13 + $0x10] sm:$0xff] }
  0x51   :  { %696 = vmatpush.bf16.msra.mxu0 %v1276_v11  ;;  %709 = vmatpush.bf16.msra.mxu1 %v1340_v15  ;;  %v1237_v11 = vld [vmem:[#allocation10 + $0x8] sm:$0xf0]  ;;  %v1304_v15 = vor.u32 %v1537_v12, %v1301_v14  ;;  %v1580_v3 = vld [vmem:[#allocation13 + $0x58] sm:$0xff]  ;;  %v1579_v5 = vld [vmem:[#allocation13 + $0x50] sm:$0xff] }
  0x52   :  { %v1240_v13 = vor.u32 %v1521_v10, %v1237_v11  ;;  %v1569_v6 = vld [vmem:[#allocation13] sm:$0xff]  ;;  %v1578_v7 = vld [vmem:[#allocation13 + $0x48] sm:$0xff] }
  0x53   :  { %722 = vmatpush.bf16.msra.mxu2 %v1280_v16  ;;  %735 = vmatpush.bf16.msra.mxu3 %v1344_v19  ;;  %v147_v16 = vld [vmem:[#allocation7] sm:$0xf] }
  0x54   :  { %v149_v17 = vperm.slane %v147_v16, 0  ;;  %v150_v18 = vperm.slane %v147_v16, 1  ;;  %v151_v30 = vperm.slane %v147_v16, 2  ;;  %v152_v32 = vperm.slane %v147_v16, 3 }
  0x55   :  { %697 = vmatpush.bf16.msra.mxu0 %v1268_v23  ;;  %710 = vmatpush.bf16.msra.mxu1 %v1332_v27  ;;  %v1560_v27 = vld [vmem:[#allocation11 + $0x38] sm:$0xff] }
  0x57   :  { %723 = vmatpush.bf16.msra.mxu2 %v1272_v28  ;;  %736 = vmatpush.bf16.msra.mxu3 %v1336_v31  ;;  %v1568_v28 = vld [vmem:[#allocation11 + $0x78] sm:$0xff] }
  0x59   :  { %698 = vmatpush.bf16.msra.mxu0 %v1260_v35  ;;  %711 = vmatpush.bf16.msra.mxu1 %v1324_v39 }
  0x5b   :  { %724 = vmatpush.bf16.msra.mxu2 %v1264_v40  ;;  %737 = vmatpush.bf16.msra.mxu3 %v1328_v43 }
  0x5d   :  { %699 = vmatpush.bf16.msra.mxu0 %v1252_v47  ;;  %712 = vmatpush.bf16.msra.mxu1 %v1316_v51  ;;  %v1557_v47 = vld [vmem:[#allocation11 + $0x20] sm:$0xff]  ;;  %v1556_v51 = vld [vmem:[#allocation11 + $0x18] sm:$0xff] }
  0x5f   :  { %725 = vmatpush.bf16.msra.mxu2 %v1256_v52  ;;  %738 = vmatpush.bf16.msra.mxu3 %v1320_v55  ;;  %v1555_v52 = vld [vmem:[#allocation11 + $0x10] sm:$0xff]  ;;  %v1554_v55 = vld [vmem:[#allocation11 + $0x8] sm:$0xff] }
  0x61   :  { %700 = vmatpush.bf16.msra.mxu0 %v1244_v59  ;;  %713 = vmatpush.bf16.msra.mxu1 %v1308_v63  ;;  %v1553_v59 = vld [vmem:[#allocation11] sm:$0xff]  ;;  %v1572_v63 = vld [vmem:[#allocation13 + $0x18] sm:$0xff] }
  0x63   :  { %726 = vmatpush.bf16.msra.mxu2 %v1248_v0  ;;  %739 = vmatpush.bf16.msra.mxu3 %v1312_v4  ;;  %v1561_v0 = vld [vmem:[#allocation11 + $0x40] sm:$0xff]  ;;  %v1570_v4 = vld [vmem:[#allocation13 + $0x8] sm:$0xff] }
  0x65   :  { %701 = vmatpush.bf16.msra.mxu0 %v1236_v8  ;;  %714 = vmatpush.bf16.msra.mxu1 %v1300_v9  ;;  %v276_v8 = vld [vmem:[%s1931_s4] sm:$0x3] }
  0x66   :  { %v1577_v9 = vld [vmem:[#allocation13 + $0x40] sm:$0xff]  ;;  %v278_v10 = vperm.slane %v276_v8, 0 }
  0x67   :  { %727 = vmatpush.bf16.msra.mxu2 %v1240_v13  ;;  %740 = vmatpush.bf16.msra.mxu3 %v1304_v15  ;;  %v279_v15 = vperm.slane %v276_v8, 1 }
  0xa5   :  { %v193_v19 = vpop.f32.mrf.mxu0  ;;  %v206_v20 = vpop.f32.mrf.mxu1 }
  0xa6   :  { %v194_v21 = vadd.f32 %v193_v19, %v149_v17  ;;  %v207_v22 = vadd.f32 %v206_v20, %v150_v18 }
  0xa8   :  { %v236_v23 = vmax.f32 %v194_v21, 0.0  ;;  %v237_v24 = vmax.f32 %v207_v22, 0.0 }
  0xaa   :  { %v240_v25 = vpack.c.bf16 %v236_v23, %v236_v23  ;;  %v241_v26 = vpack.c.bf16 %v237_v24, %v237_v24  ;;  %v528_v24 = vld [vmem:[%s1933_s6] sm:$0x3] }
  0xac   :  { %450 = vmatmul.bf16.vlgmr.msrb.gmra.mxu0 %v240_v25  ;;  %463 = vmatmul.bf16.vlgmr.msrb.gmra.mxu1 %v241_v26 }
  0xad   :  { %v219_v31 = vpop.f32.mrf.mxu2  ;;  %v232_v33 = vpop.f32.mrf.mxu3  ;;  %476 = vmatmul.bf16.vlgmr.msrb.gmra.mxu2 %v240_v25  ;;  %489 = vmatmul.bf16.vlgmr.msrb.gmra.mxu3 %v241_v26  ;;  %v530_v26 = vperm.slane %v528_v24, 0 }
  0xae   :  { %v195_v34 = vpop.f32.mrf.mxu0  ;;  %v208_v35 = vpop.f32.mrf.mxu1  ;;  %882 = vmatpush.bf16.msrb.mxu0 %v1560_v27  ;;  %895 = vmatpush.bf16.msrb.mxu1 %v1568_v28  ;;  %v220_v39 = vadd.f32 %v219_v31, %v151_v30  ;;  %v233_v40 = vadd.f32 %v232_v33, %v152_v32 }
  0xaf   :  { %1042 = vmatpush.bf16.msrb.mxu2 %v1576_v29  ;;  %1055 = vmatpush.bf16.msrb.mxu3 %v1584_v54  ;;  %v531_v34 = vperm.slane %v528_v24, 1 }
  0xb0   :  { %v238_v43 = vmax.f32 %v220_v39, 0.0  ;;  %v239_v44 = vmax.f32 %v233_v40, 0.0 }
  0xb2   :  { %883 = vmatpush.bf16.msrb.mxu0 %v1559_v36  ;;  %896 = vmatpush.bf16.msrb.mxu1 %v1567_v37  ;;  %v242_v49 = vpack.c.bf16 %v238_v43, %v238_v43  ;;  %v243_v50 = vpack.c.bf16 %v239_v44, %v239_v44 }
  0xb3   :  { %1043 = vmatpush.bf16.msrb.mxu2 %v1575_v38  ;;  %1056 = vmatpush.bf16.msrb.mxu3 %v1583_v58 }
  0xb5   :  { %v221_v45 = vpop.f32.mrf.mxu2  ;;  %v234_v46 = vpop.f32.mrf.mxu3 }
  0xb6   :  { %884 = vmatpush.bf16.msrb.mxu0 %v1558_v41  ;;  %897 = vmatpush.bf16.msrb.mxu1 %v1566_v42 }
  0xb7   :  { %1044 = vmatpush.bf16.msrb.mxu2 %v1574_v56  ;;  %1057 = vmatpush.bf16.msrb.mxu3 %v1582_v62 }
  0xba   :  { %885 = vmatpush.bf16.msrb.mxu0 %v1557_v47  ;;  %898 = vmatpush.bf16.msrb.mxu1 %v1565_v48  ;;  %v1597_v48 = vld [vmem:[%s1935_s8] ss:$0 sm:$0xff]  ;;  %s1816_s8 = smov [#allocation14]  }
  0xbb   :  { %1045 = vmatpush.bf16.msrb.mxu2 %v1573_v60  ;;  %1058 = vmatpush.bf16.msrb.mxu3 %v1581_v1  ;;  %s1086_s15 = sshll.u32 %s1816_s8, 4  ;;  %s1087_s15 = int_to_ptr.vmem [resolvable:$true] %s1086_s15 }
  0xbc   :  { %702 = vmatmul.bf16.vlgmr.msra.gmra.mxu0 %v242_v49  ;;  %715 = vmatmul.bf16.vlgmr.msra.gmra.mxu1 %v243_v50 }
  0xbd   :  { %728 = vmatmul.bf16.vlgmr.msra.gmra.mxu2 %v242_v49  ;;  %741 = vmatmul.bf16.vlgmr.msra.gmra.mxu3 %v243_v50 }
  0xbe   :  { %886 = vmatpush.bf16.msrb.mxu0 %v1556_v51  ;;  %899 = vmatpush.bf16.msrb.mxu1 %v1564_v53 }
  0xbf   :  { %1046 = vmatpush.bf16.msrb.mxu2 %v1572_v63  ;;  %1059 = vmatpush.bf16.msrb.mxu3 %v1580_v3 }
  0xc2   :  { %887 = vmatpush.bf16.msrb.mxu0 %v1555_v52  ;;  %900 = vmatpush.bf16.msrb.mxu1 %v1563_v57 }
  0xc3   :  { %1047 = vmatpush.bf16.msrb.mxu2 %v1571_v2  ;;  %1060 = vmatpush.bf16.msrb.mxu3 %v1579_v5 }
  0xc6   :  { %888 = vmatpush.bf16.msrb.mxu0 %v1554_v55  ;;  %901 = vmatpush.bf16.msrb.mxu1 %v1562_v61  ;;  %v1598_v55 = vld [vmem:[%s1937_s10] ss:$0 sm:$0xff] }
  0xc7   :  { %1048 = vmatpush.bf16.msrb.mxu2 %v1570_v4  ;;  %1061 = vmatpush.bf16.msrb.mxu3 %v1578_v7 }
  0xca   :  { %889 = vmatpush.bf16.msrb.mxu0 %v1553_v59  ;;  %902 = vmatpush.bf16.msrb.mxu1 %v1561_v0 }
  0xcb   :  { %1049 = vmatpush.bf16.msrb.mxu2 %v1569_v6  ;;  %1062 = vmatpush.bf16.msrb.mxu3 %v1577_v9 }
 0x129   :  { %v451_v11 = vpop.f32.mrf.mxu0  ;;  %v464_v12 = vpop.f32.mrf.mxu1 }
 0x12a   :  { %v452_v13 = vadd.f32 %v451_v11, %v278_v10 }
 0x12c   :  { %v465_v14 = vadd.f32 %v464_v12, %v452_v13 }
 0x12e   :  { %v494_v16 = vmax.f32 %v465_v14, 0.0 }
 0x130   :  { %v748_v17 = vpack.c.bf16 %v494_v16, %v494_v16  ;;  %v477_v18 = vpop.f32.mrf.mxu2  ;;  %v490_v19 = vpop.f32.mrf.mxu3 }
 0x131   :  { %v478_v20 = vadd.f32 %v477_v18, %v279_v15  ;;  %v453_v21 = vpop.f32.mrf.mxu0  ;;  %v466_v22 = vpop.f32.mrf.mxu1 }
 0x132   :  { %890 = vmatmul.bf16.vlgmr.msrb.gmra.mxu0 %v748_v17 }
 0x133   :  { %v491_v23 = vadd.f32 %v490_v19, %v478_v20 }
 0x135   :  { %v495_v25 = vmax.f32 %v491_v23, 0.0 }
 0x137   :  { %v749_v27 = vpack.c.bf16 %v495_v25, %v495_v25 }
 0x138   :  { %v479_v28 = vpop.f32.mrf.mxu2  ;;  %v492_v29 = vpop.f32.mrf.mxu3 }
 0x139   :  { %903 = vmatmul.bf16.vlgmr.msrb.gmra.mxu1 %v749_v27  ;;  %v703_v30 = vpop.f32.mrf.mxu0  ;;  %v716_v31 = vpop.f32.mrf.mxu1 }
 0x13a   :  { %v704_v32 = vadd.f32 %v703_v30, %v530_v26 }
 0x13c   :  { %v717_v33 = vadd.f32 %v716_v31, %v704_v32 }
 0x13e   :  { %v746_v35 = vmax.f32 %v717_v33, 0.0 }
 0x140   :  { %v908_v36 = vpack.c.bf16 %v746_v35, %v746_v35  ;;  %v729_v37 = vpop.f32.mrf.mxu2  ;;  %v742_v38 = vpop.f32.mrf.mxu3 }
 0x141   :  { %v730_v39 = vadd.f32 %v729_v37, %v531_v34  ;;  %v705_v40 = vpop.f32.mrf.mxu0  ;;  %v718_v41 = vpop.f32.mrf.mxu1 }
 0x142   :  { %1050 = vmatmul.bf16.vlgmr.msrb.gmra.mxu2 %v908_v36 }
 0x143   :  { %v743_v42 = vadd.f32 %v742_v38, %v730_v39 }
 0x145   :  { %v747_v43 = vmax.f32 %v743_v42, 0.0 }
 0x147   :  { %v909_v44 = vpack.c.bf16 %v747_v43, %v747_v43 }
 0x148   :  { %v731_v45 = vpop.f32.mrf.mxu2  ;;  %v744_v46 = vpop.f32.mrf.mxu3 }
 0x149   :  { %1063 = vmatmul.bf16.vlgmr.msrb.gmra.mxu3 %v909_v44 }
 0x1af   :  { %v891_v47 = vpop.f32.mrf.mxu0 }
 0x1b0   :  { %v892_v49 = vadd.f32 %v1597_v48, %v891_v47 }
 0x1b6   :  { %v904_v50 = vpop.f32.mrf.mxu1 }
 0x1b7   :  { %v905_v51 = vadd.f32 %v904_v50, %v892_v49  ;;  %v893_v52 = vpop.f32.mrf.mxu0 }
 0x1b9   :  { %1078 = vst [vmem:[#allocation14] sm:$0xff] %v905_v51 }
 0x1be   :  { %v906_v53 = vpop.f32.mrf.mxu1 }
 0x1c5   :  { %v1051_v54 = vpop.f32.mrf.mxu2 }
 0x1c6   :  { %v1052_v56 = vadd.f32 %v1598_v55, %v1051_v54 }
 0x1cc   :  { %v1064_v57 = vpop.f32.mrf.mxu3 }
 0x1cd   :  { %v1065_v58 = vadd.f32 %v1064_v57, %v1052_v56  ;;  %v1053_v59 = vpop.f32.mrf.mxu2 }
 0x1cf   :  { %1080 = vst [vmem:[#allocation14 + $0x10] sm:$0xff] %v1065_v58  ;;  %1068 = vmax.xlane.f32.xlu0 %v1065_v58 }
 0x1d4   :  { %v1066_v60 = vpop.f32.mrf.mxu3 }
 0x242   :  { %v1069_v61 = vpop.xlane.xlu0 %1068 }
 0x243   :  { %v1070_v62 = vsub.f32 %v1065_v58, %v1069_v61 }
 0x245   :  { %v1071_v63 = vmul.f32 1.442695, %v1070_v62 }
 0x247   :  { %1599 = vpow2.f32 %v1071_v63 }
 0x24d   :  { %v1600_v0 = vpop.eup %1599 }
 0x24e   :  { %1073 = vadd.xlane.f32.xlu0 %v1600_v0 }
 0x2c1   :  { %v1074_v1 = vpop.xlane.xlu0 %1073 }
 0x2c2   :  { %1601 = vlog2.f32 %v1074_v1 }
 0x2c8   :  { %v1602_v2 = vpop.eup %1601 }
 0x2c9   :  { %v1076_v3 = vmul.f32 0.6931472, %v1602_v2 }
 0x2cb   :  { %v1077_v4 = vsub.f32 %v1070_v62, %v1076_v3 }
 0x2cd   :  { %1079 = vst [vmem:[#allocation14 + $0x8] sm:$0xff] %v1077_v4 }
 0x2ce   :  { %1091 = dma.vmem_to_hbm [thread:$0]  %s1087_s15, 384, %s1089_s17, [#allocation4]  }
 0x2cf   :  { %1803 = dma.done.wait [#allocation4], 384  }
 0x2d0   :  { %1804 = vsyncadd [#allocation4], 4294966912 }
 0x2d1   :  { %1096 = vsyncpa [#allocation3], 1 }
 0x2d2   :  { %1097 = vsyncpa [#allocation6], 1 }
 0x2d3   :  { %1098 = vsyncpa [#allocation9], 1 }
 0x2d4   :  { %1099 = vsyncpa [#allocation12], 1 }
 0x2d5   :  { %1100 = vsyncpa [#allocation4], 1 }

</bundles_post_ra>
